<compile_context>
chip_gen: v7x
topology: tpu7x:2x2x1
jax: 0.10.0
libtpu: 0.0.40
codegen_flags: <defaults>
</compile_context>

<pallas_src>
import jax
import jax.numpy as jnp
from jax.experimental import pallas as pl
from jax.experimental.pallas import tpu as pltpu


def trend_layer_kernel(z_ref, w1_ref, b1_ref, w2p_ref, b2p_ref, out_ref):
    # dense1 + ReLU (MXU matmul; bias add / max are free VPU filler).
    h = jnp.dot(z_ref[...], w1_ref[...],
                preferred_element_type=jnp.float32) + b1_ref[...]
    h = jnp.maximum(h, 0.0)
    # Fused dense2 + poly projection + permute: W2' already contains the poly
    # basis in (s, f) output order, so this is a single lane-dense
    # (TB, FP) @ (FP, S*F) matmul writing the final layout directly.
    out_ref[...] = jnp.dot(h, w2p_ref[...],
                           preferred_element_type=jnp.float32) + b2p_ref[...]


def _pick_batch_tile(batch, latent_dim, sf, batch_tile):
    """Largest batch tile that keeps the double-buffered z/out slabs ~<=8MiB."""
    if batch <= batch_tile:
        return batch
    row_bytes = 4 * (latent_dim + sf) * 2          # f32, double-buffered in+out
    budget = 8 * 1024 * 1024
    tb = max(8, (budget // max(row_bytes, 1)) // 8 * 8)
    return min(batch_tile, tb)


def trend_layer_forward(z, w1, b1, w2, b2, *, seq_len, feat_dim, trend_poly,
                        batch_tile=512):
    batch, latent_dim = z.shape
    fp = feat_dim * trend_poly
    sf = seq_len * feat_dim

    # ---- wrapper-side parameter folding (parameter-only; XLA const-folds) --
    lin_space = jnp.arange(0, float(seq_len), 1.0, dtype=jnp.float32) / seq_len
    poly_space = jnp.stack(
        [lin_space ** float(p + 1) for p in range(trend_poly)], axis=0)  # (P,S)

    # Fold poly AND the final (0,2,1) permute into the weights: output index
    # ordering is (s, f) so the kernel's flat output is already (B, S, F).
    w2p = jnp.einsum("kfp,ps->ksf",
                     w2.reshape(fp, feat_dim, trend_poly),
                     poly_space).reshape(fp, sf)                 # (FP, S*F)
    b2p = jnp.einsum("fp,ps->sf",
                     b2.reshape(feat_dim, trend_poly),
                     poly_space).reshape(1, sf)                  # (1, S*F)
    b1p = b1.reshape(1, fp)                                      # (1, FP)

    # ---- batch tiling -------------------------------------------------------
    tb = _pick_batch_tile(batch, latent_dim, sf, batch_tile)
    padded_b = pl.cdiv(batch, tb) * tb
    if padded_b != batch:
        z = jnp.pad(z, ((0, padded_b - batch), (0, 0)))
    grid = (padded_b // tb,)

    cost = pl.CostEstimate(
        flops=2 * padded_b * (latent_dim * fp + fp * sf),
        transcendentals=0,
        bytes_accessed=4 * (padded_b * latent_dim + latent_dim * fp + fp
                            + fp * sf + sf + padded_b * sf))

    out_flat = pl.pallas_call(
        trend_layer_kernel,
        out_shape=jax.ShapeDtypeStruct((padded_b, sf), jnp.float32),
        grid=grid,
        in_specs=[
            pl.BlockSpec((tb, latent_dim), lambda i: (i, 0)),   # z tile (pipelined)
            pl.BlockSpec((latent_dim, fp), lambda i: (0, 0)),   # W1  (VMEM-resident)
            pl.BlockSpec((1, fp),          lambda i: (0, 0)),   # b1  (resident)
            pl.BlockSpec((fp, sf),         lambda i: (0, 0)),   # W2' (resident)
            pl.BlockSpec((1, sf),          lambda i: (0, 0)),   # b2' (resident)
        ],
        out_specs=pl.BlockSpec((tb, sf), lambda i: (i, 0)),     # lane-dense slab
        compiler_params=pltpu.CompilerParams(
            dimension_semantics=("parallel",)),
        cost_estimate=cost,
    )(z, w1, b1p, w2p, b2p)

    # glue: drop batch padding; (B, S*F) -> (B, S, F) is a free view (no
    # transpose — the permute was folded into W2').
    return out_flat[:batch].reshape(batch, seq_len, feat_dim)


def reference_forward(z, w1, b1, w2, b2, *, seq_len, feat_dim, trend_poly):
    h = jax.nn.relu(z @ w1 + b1)
    tp = (h @ w2 + b2).reshape(-1, feat_dim, trend_poly)
    lin_space = jnp.arange(0, float(seq_len), 1.0, dtype=jnp.float32) / seq_len
    poly_space = jnp.stack([lin_space ** float(p + 1) for p in range(trend_poly)],
                           axis=0)
    trend = jnp.einsum("bfp,ps->bfs", tp, poly_space)
    return jnp.transpose(trend, (0, 2, 1))


if __name__ == "__main__":
    # Small shapes consistent with the module's constructor.
    batch = 2
    seq_len = 8
    feat_dim = 4
    latent_dim = 8
    trend_poly = 3
    fp = feat_dim * trend_poly

    key = jax.random.PRNGKey(0)
    kz, k1, k2, k3, k4 = jax.random.split(key, 5)

    z = jax.random.normal(kz, (batch, latent_dim), dtype=jnp.float32)
    # Deterministic synthetic parameters (stored as (in, out) = W^T of nn.Linear).
    w1 = jax.random.normal(k1, (latent_dim, fp), dtype=jnp.float32) * 0.1
    b1 = jax.random.normal(k2, (fp,), dtype=jnp.float32) * 0.1
    w2 = jax.random.normal(k3, (fp, fp), dtype=jnp.float32) * 0.1
    b2 = jax.random.normal(k4, (fp,), dtype=jnp.float32) * 0.1

    out = trend_layer_forward(z, w1, b1, w2, b2,
                              seq_len=seq_len, feat_dim=feat_dim,
                              trend_poly=trend_poly)
    out = jax.block_until_ready(out)

    ref = reference_forward(z, w1, b1, w2, b2,
                            seq_len=seq_len, feat_dim=feat_dim,
                            trend_poly=trend_poly)
    assert out.shape == (batch, seq_len, feat_dim)
    assert jnp.allclose(out, ref, atol=1e-5, rtol=1e-5)

    print("KERNEL_OK")
</pallas_src>

<mosaic_0001>
module attributes {stable_mosaic.version = 11 : i64} {
  func.func @trend_layer_kernel(%arg0: i32, %arg1: memref<2x8xf32, #tpu.memory_space<vmem>>, %arg2: memref<8x12xf32, #tpu.memory_space<vmem>>, %arg3: memref<1x12xf32, #tpu.memory_space<vmem>>, %arg4: memref<12x32xf32, #tpu.memory_space<vmem>>, %arg5: memref<1x32xf32, #tpu.memory_space<vmem>>, %arg6: memref<2x32xf32, #tpu.memory_space<vmem>>) attributes {dimension_semantics = [#tpu.dimension_semantics<parallel>], iteration_bounds = array<i64: 1>, scalar_prefetch = 0 : i64, scratch_operands = 0 : i64, tpu.core_type = #tpu.core_type<tc>, window_params = [{transform_indices = @transform_0, window_bounds = array<i64: 2, 8>}, {pipeline_mode = #tpu.pipeline_mode<synchronous>, transform_indices = @transform_1, window_bounds = array<i64: 8, 12>}, {pipeline_mode = #tpu.pipeline_mode<synchronous>, transform_indices = @transform_2, window_bounds = array<i64: 1, 12>}, {pipeline_mode = #tpu.pipeline_mode<synchronous>, transform_indices = @transform_3, window_bounds = array<i64: 12, 32>}, {pipeline_mode = #tpu.pipeline_mode<synchronous>, transform_indices = @transform_4, window_bounds = array<i64: 1, 32>}, {transform_indices = @transform_5, window_bounds = array<i64: 2, 32>}]} {
    %c0 = arith.constant 0 : index
    %c0_0 = arith.constant 0 : index
    %0 = vector.load %arg1[%c0, %c0_0] : memref<2x8xf32, #tpu.memory_space<vmem>>, vector<2x8xf32>
    %c0_1 = arith.constant 0 : index
    %c0_2 = arith.constant 0 : index
    %1 = vector.load %arg2[%c0_1, %c0_2] : memref<8x12xf32, #tpu.memory_space<vmem>>, vector<8x12xf32>
    %cst = arith.constant dense<0.000000e+00> : vector<2x12xf32>
    %2 = tpu.matmul %0, %1, %cst {dimension_numbers = #tpu.dot_dimension_numbers<[1], [0], [0], [1], [0, 0, 1, 1], [], []>} : vector<2x8xf32>, vector<8x12xf32>, vector<2x12xf32> -> vector<2x12xf32>
    %c0_3 = arith.constant 0 : index
    %c0_4 = arith.constant 0 : index
    %3 = vector.load %arg3[%c0_3, %c0_4] : memref<1x12xf32, #tpu.memory_space<vmem>>, vector<1x12xf32>
    %4 = vector.broadcast %3 : vector<1x12xf32> to vector<2x12xf32>
    %5 = arith.addf %2, %4 : vector<2x12xf32>
    %cst_5 = arith.constant 0.000000e+00 : f32
    %6 = vector.broadcast %cst_5 : f32 to vector<2x12xf32>
    %7 = arith.maximumf %5, %6 : vector<2x12xf32>
    %c0_6 = arith.constant 0 : index
    %c0_7 = arith.constant 0 : index
    %8 = vector.load %arg4[%c0_6, %c0_7] : memref<12x32xf32, #tpu.memory_space<vmem>>, vector<12x32xf32>
    %cst_8 = arith.constant dense<0.000000e+00> : vector<2x32xf32>
    %9 = tpu.matmul %7, %8, %cst_8 {dimension_numbers = #tpu.dot_dimension_numbers<[1], [0], [0], [1], [0, 0, 1, 1], [], []>} : vector<2x12xf32>, vector<12x32xf32>, vector<2x32xf32> -> vector<2x32xf32>
    %c0_9 = arith.constant 0 : index
    %c0_10 = arith.constant 0 : index
    %10 = vector.load %arg5[%c0_9, %c0_10] : memref<1x32xf32, #tpu.memory_space<vmem>>, vector<1x32xf32>
    %11 = vector.broadcast %10 : vector<1x32xf32> to vector<2x32xf32>
    %12 = arith.addf %9, %11 : vector<2x32xf32>
    %c0_11 = arith.constant 0 : index
    %c0_12 = arith.constant 0 : index
    %13 = vector.load %arg6[%c0_11, %c0_12] : memref<2x32xf32, #tpu.memory_space<vmem>>, vector<2x32xf32>
    tpu.vector_store %arg6[%c0_11, %c0_12], %12 {strides = array<i32>} : memref<2x32xf32, #tpu.memory_space<vmem>>, vector<2x32xf32>,
    return
  }
  func.func @transform_0(%arg0: i32) -> (i32, i32) {
    %c0_i32 = arith.constant 0 : i32
    %c0_i32_0 = arith.constant 0 : i32
    return %arg0, %c0_i32 : i32, i32
  }
  func.func @transform_1(%arg0: i32) -> (i32, i32) {
    %c0_i32 = arith.constant 0 : i32
    %c0_i32_0 = arith.constant 0 : i32
    %c0_i32_1 = arith.constant 0 : i32
    return %c0_i32, %c0_i32_0 : i32, i32
  }
  func.func @transform_2(%arg0: i32) -> (i32, i32) {
    %c0_i32 = arith.constant 0 : i32
    %c0_i32_0 = arith.constant 0 : i32
    %c0_i32_1 = arith.constant 0 : i32
    return %c0_i32, %c0_i32_0 : i32, i32
  }
  func.func @transform_3(%arg0: i32) -> (i32, i32) {
    %c0_i32 = arith.constant 0 : i32
    %c0_i32_0 = arith.constant 0 : i32
    %c0_i32_1 = arith.constant 0 : i32
    return %c0_i32, %c0_i32_0 : i32, i32
  }
  func.func @transform_4(%arg0: i32) -> (i32, i32) {
    %c0_i32 = arith.constant 0 : i32
    %c0_i32_0 = arith.constant 0 : i32
    %c0_i32_1 = arith.constant 0 : i32
    return %c0_i32, %c0_i32_0 : i32, i32
  }
  func.func @transform_5(%arg0: i32) -> (i32, i32) {
    %c0_i32 = arith.constant 0 : i32
    %c0_i32_0 = arith.constant 0 : i32
    return %arg0, %c0_i32 : i32, i32
  }
}

</mosaic_0001>

<bundles_post_ra>
// kernel: tpu_custom_call.1
= control target key start
LH: loop header
LB: loop body
LE: loop exit
PB: predicated region body
PF: predicated region fallthrough
CT: control target
= control target key end

     0   :  { %10 = vsyncpa [#allocation3], 0  ;;  %s471_s0 = inlined_call_operand.hbm [shape: f32[2,8], index: 0, kind: input, shape index: {}]   ;;  %s472_s1 = inlined_call_operand.hbm [shape: f32[8,12], index: 1, kind: input, shape index: {}]   ;;  %s473_s2 = inlined_call_operand.vmem [shape: f32[1,12], index: 2, kind: input, shape index: {}]   ;;  %s474_s3 = inlined_call_operand.hbm [shape: f32[12,32], index: 3, kind: input, shape index: {}]   ;;  %s475_s4 = inlined_call_operand.vmem [shape: f32[1,32], index: 4, kind: input, shape index: {}]   ;;  %s476_s5 = inlined_call_operand.hbm [shape: f32[2,32], index: 5, kind: output, shape index: {}]  }
   0x1   :  { %11 = vsyncpa [#allocation6], 0 }
   0x2   :  { %12 = vsyncpa [#allocation4], 0  ;;  %s377_s18 = smov [#allocation5]   ;;  %s378_s20 = smov [#allocation2]  }
   0x3   :  { %s29_s19 = sshll.u32 %s377_s18, 4  ;;  %s19_s21 = sshll.u32 %s378_s20, 4  ;;  %s30_s19 = int_to_ptr.vmem [resolvable:$true] %s29_s19  ;;  %s20_s21 = int_to_ptr.vmem [resolvable:$true] %s19_s21 }
   0x4   :  { %s283_s24 = scalar_lea.hbm %s472_s1, 128 }
   0x5   :  { %p284_p0 = scmp.ne.s32.totalorder %s472_s1, %s283_s24  ;;  %p287_p1 = scmp.lt.u32.totalorder %s283_s24, %s472_s1 }
   0x7   :  { %p289_p2 = pnand %p287_p1, %p284_p0 }
   0x9   :  { %292 = shalt.err (!%p289_p2)
}
   0xa   :  { %s293_s29 = scalar_lea.vmem %s30_s19, 128  ;;  %p298_p4 = scmp.lt.s32.totalorder %s30_s19, %s30_s19 }
   0xb   :  { %p294_p3 = scmp.ne.s32.totalorder %s30_s19, %s293_s29  ;;  %p299_p5 = scmp.lt.s32.totalorder %s293_s29, %s293_s29 }
   0xd   :  { %p300_p6 = por %p299_p5, %p298_p4 }
   0xf   :  { %p301_p7 = pnand %p300_p6, %p294_p3 }
  0x11   :  { %304 = shalt.err (!%p301_p7)
}
  0x12   :  { %32 = dma.hbm_to_vmem [thread:$0]  %s472_s1, 128, %s30_s19, [#allocation6]  }
  0x13   :  { %s305_s9 = scalar_lea.hbm %s471_s0, 32 }
  0x14   :  { %p306_p8 = scmp.ne.s32.totalorder %s471_s0, %s305_s9  ;;  %p309_p9 = scmp.lt.u32.totalorder %s305_s9, %s471_s0 }
  0x16   :  { %p311_p10 = pnand %p309_p9, %p306_p8 }
  0x18   :  { %314 = shalt.err (!%p311_p10)
}
  0x19   :  { %s315_s14 = scalar_lea.vmem %s20_s21, 32  ;;  %p320_p12 = scmp.lt.s32.totalorder %s20_s21, %s20_s21 }
  0x1a   :  { %p316_p11 = scmp.ne.s32.totalorder %s20_s21, %s315_s14  ;;  %p321_p13 = scmp.lt.s32.totalorder %s315_s14, %s315_s14 }
  0x1c   :  { %p322_p0 = por %p321_p13, %p320_p12 }
  0x1e   :  { %p323_p1 = pnand %p322_p0, %p316_p11 }
  0x20   :  { %326 = shalt.err (!%p323_p1)
}
  0x21   :  { %22 = dma.hbm_to_vmem [thread:$0]  %s471_s0, 32, %s20_s21, [#allocation3]  }
  0x22   :  { %s379_s16 = smov [#allocation7]   ;;  %s327_s20 = scalar_lea.hbm %s474_s3, 256 }
  0x23   :  { %s40_s17 = sshll.u32 %s379_s16, 4  ;;  %p328_p2 = scmp.ne.s32.totalorder %s474_s3, %s327_s20  ;;  %s41_s17 = int_to_ptr.vmem [resolvable:$true] %s40_s17 }
  0x24   :  { %p331_p3 = scmp.lt.u32.totalorder %s327_s20, %s474_s3 }
  0x26   :  { %p333_p4 = pnand %p331_p3, %p328_p2 }
  0x28   :  { %336 = shalt.err (!%p333_p4)
}
  0x29   :  { %s337_s26 = scalar_lea.vmem %s41_s17, 256  ;;  %p342_p6 = scmp.lt.s32.totalorder %s41_s17, %s41_s17 }
  0x2a   :  { %p338_p5 = scmp.ne.s32.totalorder %s41_s17, %s337_s26  ;;  %p343_p7 = scmp.lt.s32.totalorder %s337_s26, %s337_s26 }
  0x2c   :  { %p344_p8 = por %p343_p7, %p342_p6 }
  0x2e   :  { %p345_p9 = pnand %p344_p8, %p338_p5 }
  0x30   :  { %348 = shalt.err (!%p345_p9)
}
  0x31   :  { %s380_s0 = smov 128   ;;  %s381_s21 = smov 8  }
  0x32   :  { %46 = dma.hbm_to_vmem [thread:$0]  %s474_s3, 256, %s41_s17, [#allocation6], %s380_s0, %s380_s0, %s381_s21  }
  0x33   :  { %371 = dma.done.wait [#allocation3], 32  }
  0x34   :  { %372 = vsyncadd [#allocation3], 4294967264 }
  0x35   :  { %373 = dma.done.wait [#allocation6], 384  }
  0x36   :  { %374 = vsyncadd [#allocation6], 4294966912  ;;  %v382_v0 = vmov 0.0   ;;  %vm383_vm0 = vmmov 0   ;;  %vm67_vm1 = vcmask 64512   ;;  %v59_v1 = vld [vmem:[#allocation5] sm:$0xff] }
  0x37   :  { %257 = vmatprep.subr.mxu0 %v382_v0  ;;  %259 = vmatprep.mubr.msk.f32.mxu0 %vm383_vm0, %v382_v0  ;;  %v58_v2 = vld [vmem:[#allocation2] sm:$0x3]  ;;  %v142_v3 = vld [vmem:[#allocation7] sm:$0xff]  ;;  %v143_v4 = vld [vmem:[#allocation7 + $0x8] sm:$0xf]  ;;  %vm155_vm2 = vcmask 1043456  }
  0x38   :  { %266 = vmatprep.mubr.msk.f32.mxu1 %vm383_vm0, %v382_v0  ;;  %258 = vmatpush3.msra.mxu0 %v59_v1  ;;  %v270_v5 = vpack.c.bf16 %v143_v4, %v142_v3  ;;  %v384_v6 = vmov 0.0|0.0   ;;  %vm385_vm3 = vmmov 1   ;;  %v247_v7 = vld [vmem:[%s473_s2] ss:$0 sm:$0xff]  ;;  %vm151_vm5 = vcmask 97280   ;;  %s386_s7 = smov [#allocation8]  }
  0x39   :  { %260 = vmatmul.mubr.msk.f32.vlgmr.msra.gmra.mrb[0].mxu0 %vm67_vm1, %v58_v2  ;;  %269 = vmatprep.subr.bf16.mxu1 %v384_v6  ;;  %vm271_vm4 = vmpackc.low %vm155_vm2, %vm385_vm3  ;;  %v249_v12 = vld [vmem:[%s475_s4] ss:$0 sm:$0xff]  ;;  %s237_s8 = sshll.u32 %s386_s7, 4  ;;  %vm229_vm6 = vcmask 254976   ;;  %s238_s8 = int_to_ptr.vmem [resolvable:$true] %s237_s8 }
  0x3a   :  { %272 = vmatpush3.bf16.msk.msra.mxu1 %vm271_vm4, %v270_v5  ;;  %s349_s9 = scalar_lea.vmem %s238_s8, 32  ;;  %p354_p11 = scmp.lt.s32.totalorder %s238_s8, %s238_s8 }
  0x3b   :  { %p350_p10 = scmp.ne.s32.totalorder %s238_s8, %s349_s9  ;;  %p355_p12 = scmp.lt.s32.totalorder %s349_s9, %s349_s9 }
  0x3d   :  { %p356_p13 = por %p355_p12, %p354_p11 }
  0x3f   :  { %p357_p0 = pnand %p356_p13, %p350_p10 }
 0x10c   :  { %v137_v8 = vpop.f32.mrb[0].mxu0 }
 0x10d   :  { %v138_v9 = vadd.f32 %v247_v7, %v137_v8  ;;  %v261_v10 = vpop.f32.mrb[1].mxu0 }
 0x10f   :  { %v141_v11 = vmax.f32 %v138_v9, 0.0 }
 0x111   :  { %267 = vmatmul.mubr.msk.f32.vlgmr.msra.gmra.mrb[0].mxu1 %vm151_vm5, %v141_v11 }
 0x1e4   :  { %v225_v13 = vpop.f32.mrb[0].mxu1 }
 0x1e5   :  { %v226_v14 = vadd.f32 %v249_v12, %v225_v13  ;;  %v268_v15 = vpop.f32.mrb[1].mxu1 }
 0x1e7   :  { %230 = vst.msk [vmem:[#allocation8] sm:$0x3] %vm229_vm6, %v226_v14 }
 0x1e8   :  { %360 = shalt.err (!%p357_p0)
}
 0x1e9   :  { %s361_s11 = scalar_lea.hbm %s476_s5, 32 }
 0x1ea   :  { %p362_p1 = scmp.ne.s32.totalorder %s476_s5, %s361_s11  ;;  %p365_p2 = scmp.lt.u32.totalorder %s361_s11, %s476_s5 }
 0x1ec   :  { %p367_p3 = pnand %p365_p2, %p362_p1 }
 0x1ee   :  { %370 = shalt.err (!%p367_p3)
}
 0x1ef   :  { %240 = dma.vmem_to_hbm [thread:$0]  %s238_s8, 32, %s476_s5, [#allocation4]  }
 0x1f0   :  { %375 = dma.done.wait [#allocation4], 32  }
 0x1f1   :  { %376 = vsyncadd [#allocation4], 4294967264 }
 0x1f2   :  { %244 = vsyncpa [#allocation3], 1 }
 0x1f3   :  { %245 = vsyncpa [#allocation6], 1 }
 0x1f4   :  { %246 = vsyncpa [#allocation4], 1 }

</bundles_post_ra>
